<compile_context>
chip_gen: v7x
topology: tpu7x:2x2x1
jax: 0.10.0
libtpu: 0.0.40
codegen_flags: <defaults>
</compile_context>

<pallas_src>
import jax
import jax.numpy as jnp
from jax.experimental import pallas as pl
from jax.experimental.pallas import tpu as pltpu

_PAD = 128            # lane-dense padded feature width used everywhere
_N_LAYERS = 5
_D_IN = 24            # 8 hex elements x 3
_D_OUT = 20
_LAYER_DIMS = [(24, 50), (50, 50), (50, 40), (40, 30), (30, 20)]


def _round_up(x, m):
    return ((x + m - 1) // m) * m


# ----------------------------- Pallas kernel ------------------------------ #
def _mlp_kernel(x_ref, w_ref, b_ref, o_ref):
    """Fused 5-layer MLP forward for one batch tile (all math in f32).

    x_ref: [tb, 128]       input tile (features 0..23 valid, rest zero)
    w_ref: [5, 128, 128]   packed, zero-padded weight slab ([in, out] layout)
    b_ref: [5, 1, 128]     packed, zero-padded bias slab
    o_ref: [tb, 128]       lane-dense output tile (columns 0..19 valid)
    """
    h = x_ref[...]
    for l in range(_N_LAYERS):           # unrolled at trace time
        h = jnp.dot(h, w_ref[l], preferred_element_type=jnp.float32) + b_ref[l]
        if l < _N_LAYERS - 1:
            h = jnp.maximum(h, 0.0)       # ReLU; padded lanes stay exactly 0
    o_ref[...] = h


# ------------------------------- Wrapper ----------------------------------- #
def pack_params(params):
    """Pack per-layer w{l} ([in,out]) / b{l} ([1,out]) into zero-padded slabs."""
    w_slab = jnp.zeros((_N_LAYERS, _PAD, _PAD), jnp.float32)
    b_slab = jnp.zeros((_N_LAYERS, 1, _PAD), jnp.float32)
    for idx, (fi, fo) in enumerate(_LAYER_DIMS):
        w = params[f"w{idx + 1}"].astype(jnp.float32)
        b = params[f"b{idx + 1}"].astype(jnp.float32).reshape(-1)
        w_slab = w_slab.at[idx, :fi, :fo].set(w)
        b_slab = b_slab.at[idx, 0, :fo].set(b)
    return w_slab, b_slab


def dlcm_hex_8_5_forward(x, params, *, batch_tile=512):
    """x: [B, 24] float32.  params: dict of w1..w5 ([in,out]) / b1..b5 ([1,out])."""
    B, D_in = x.shape
    assert D_in == _D_IN, f"expected {_D_IN} input features, got {D_in}"

    w_slab, b_slab = pack_params(params)

    # Tiny batches: single grid step (no pipeline prologue waste).
    # Large batches: tile by `batch_tile` and pad the tail.
    if B <= batch_tile:
        tb = _round_up(B, 8)
    else:
        tb = batch_tile
    B_pad = _round_up(B, tb)
    grid = (B_pad // tb,)

    # Zero-pad input batch/lanes into a lane-dense [B_pad, 128] slab.
    x_pad = jnp.zeros((B_pad, _PAD), jnp.float32)
    x_pad = x_pad.at[:B, :D_in].set(x.astype(jnp.float32))

    flops_per_tile = 2 * tb * _PAD * _PAD * _N_LAYERS
    cost = pl.CostEstimate(
        flops=flops_per_tile * grid[0],
        transcendentals=0,
        bytes_accessed=(x_pad.size + w_slab.size + b_slab.size + B_pad * _PAD) * 4,
    )

    fn = pl.pallas_call(
        _mlp_kernel,
        out_shape=jax.ShapeDtypeStruct((B_pad, _PAD), jnp.float32),
        grid_spec=pltpu.PrefetchScalarGridSpec(
            num_scalar_prefetch=0,
            grid=grid,
            in_specs=[
                pl.BlockSpec((tb, _PAD), lambda i: (i, 0)),
                pl.BlockSpec((_N_LAYERS, _PAD, _PAD), lambda i: (0, 0, 0)),
                pl.BlockSpec((_N_LAYERS, 1, _PAD), lambda i: (0, 0, 0)),
            ],
            out_specs=pl.BlockSpec((tb, _PAD), lambda i: (i, 0)),
        ),
        compiler_params=pltpu.CompilerParams(
            dimension_semantics=("parallel",)),
        cost_estimate=cost,
    )
    out = fn(x_pad, w_slab, b_slab)
    # Strip batch-tail padding and the lane padding of the 20-wide output.
    return out[:B, :_D_OUT]


# --------------------------- Parameter creation ---------------------------- #
def init_params(key):
    """Deterministic synthetic init matching the nn.Linear shapes.

    PyTorch Linear(in, out) has weight [out, in]; we store its transpose
    [in, out] and bias as [1, out].
    """
    params = {}
    for idx, (fan_in, fan_out) in enumerate(_LAYER_DIMS, start=1):
        key, kw, kb = jax.random.split(key, 3)
        bound = 1.0 / jnp.sqrt(fan_in)  # same scale as PyTorch default init
        params[f"w{idx}"] = jax.random.uniform(
            kw, (fan_in, fan_out), jnp.float32, minval=-bound, maxval=bound)
        params[f"b{idx}"] = jax.random.uniform(
            kb, (1, fan_out), jnp.float32, minval=-bound, maxval=bound)
    return params


# --------------------------- Reference (pure JAX) --------------------------- #
def reference_forward(x, params):
    h = x
    for l in range(1, 6):
        h = h @ params[f"w{l}"] + params[f"b{l}"]
        if l < 5:
            h = jnp.maximum(h, 0.0)
    return h


if __name__ == "__main__":
    key = jax.random.PRNGKey(0)
    key, kx1, kx2 = jax.random.split(key, 3)
    params = init_params(key)

    # Small demo batch: runs as a single grid step.
    B1 = 16
    x1 = jax.random.normal(kx1, (B1, _D_IN), jnp.float32)   # 8 hex elements x 3
    out1 = jax.block_until_ready(dlcm_hex_8_5_forward(x1, params))
    ref1 = reference_forward(x1, params)
    assert out1.shape == (B1, _D_OUT), out1.shape
    assert jnp.allclose(out1, ref1, atol=1e-5, rtol=1e-5), \
        f"max abs err {jnp.max(jnp.abs(out1 - ref1))}"

    # Larger, non-divisible batch: exercises batch tiling + tail padding.
    B2 = 300
    x2 = jax.random.normal(kx2, (B2, _D_IN), jnp.float32)
    out2 = jax.block_until_ready(
        dlcm_hex_8_5_forward(x2, params, batch_tile=128))
    ref2 = reference_forward(x2, params)
    assert out2.shape == (B2, _D_OUT), out2.shape
    assert jnp.allclose(out2, ref2, atol=1e-5, rtol=1e-5), \
        f"max abs err {jnp.max(jnp.abs(out2 - ref2))}"

    print("KERNEL_OK")
</pallas_src>

<mosaic_0001>
module attributes {stable_mosaic.version = 11 : i64} {
  func.func @_mlp_kernel(%arg0: i32, %arg1: memref<16x128xf32, #tpu.memory_space<vmem>>, %arg2: memref<5x128x128xf32, #tpu.memory_space<vmem>>, %arg3: memref<5x1x128xf32, #tpu.memory_space<vmem>>, %arg4: memref<16x128xf32, #tpu.memory_space<vmem>>) attributes {dimension_semantics = [#tpu.dimension_semantics<parallel>], iteration_bounds = array<i64: 1>, scalar_prefetch = 0 : i64, scratch_operands = 0 : i64, tpu.core_type = #tpu.core_type<tc>, window_params = [{transform_indices = @transform_0, window_bounds = array<i64: 16, 128>}, {pipeline_mode = #tpu.pipeline_mode<synchronous>, transform_indices = @transform_1, window_bounds = array<i64: 5, 128, 128>}, {pipeline_mode = #tpu.pipeline_mode<synchronous>, transform_indices = @transform_2, window_bounds = array<i64: 5, 1, 128>}, {transform_indices = @transform_3, window_bounds = array<i64: 16, 128>}]} {
    %c0 = arith.constant 0 : index
    %c0_0 = arith.constant 0 : index
    %0 = vector.load %arg1[%c0, %c0_0] : memref<16x128xf32, #tpu.memory_space<vmem>>, vector<16x128xf32>
    %c0_1 = arith.constant 0 : index
    %c0_2 = arith.constant 0 : index
    %c0_3 = arith.constant 0 : index
    %1 = vector.load %arg2[%c0_1, %c0_2, %c0_3] : memref<5x128x128xf32, #tpu.memory_space<vmem>>, vector<1x128x128xf32>
    %2 = vector.shape_cast %1 : vector<1x128x128xf32> to vector<128x128xf32>
    %cst = arith.constant dense<0.000000e+00> : vector<16x128xf32>
    %3 = tpu.matmul %0, %2, %cst {dimension_numbers = #tpu.dot_dimension_numbers<[1], [0], [0], [1], [0, 0, 1, 1], [], []>} : vector<16x128xf32>, vector<128x128xf32>, vector<16x128xf32> -> vector<16x128xf32>
    %c0_4 = arith.constant 0 : index
    %c0_5 = arith.constant 0 : index
    %c0_6 = arith.constant 0 : index
    %4 = vector.load %arg3[%c0_4, %c0_5, %c0_6] : memref<5x1x128xf32, #tpu.memory_space<vmem>>, vector<1x1x128xf32>
    %5 = vector.shape_cast %4 : vector<1x1x128xf32> to vector<1x128xf32>
    %6 = vector.broadcast %5 : vector<1x128xf32> to vector<16x128xf32>
    %7 = arith.addf %3, %6 : vector<16x128xf32>
    %cst_7 = arith.constant 0.000000e+00 : f32
    %8 = vector.broadcast %cst_7 : f32 to vector<16x128xf32>
    %9 = arith.maximumf %7, %8 : vector<16x128xf32>
    %c1 = arith.constant 1 : index
    %c0_8 = arith.constant 0 : index
    %c0_9 = arith.constant 0 : index
    %10 = vector.load %arg2[%c1, %c0_8, %c0_9] : memref<5x128x128xf32, #tpu.memory_space<vmem>>, vector<1x128x128xf32>
    %11 = vector.shape_cast %10 : vector<1x128x128xf32> to vector<128x128xf32>
    %cst_10 = arith.constant dense<0.000000e+00> : vector<16x128xf32>
    %12 = tpu.matmul %9, %11, %cst_10 {dimension_numbers = #tpu.dot_dimension_numbers<[1], [0], [0], [1], [0, 0, 1, 1], [], []>} : vector<16x128xf32>, vector<128x128xf32>, vector<16x128xf32> -> vector<16x128xf32>
    %c1_11 = arith.constant 1 : index
    %c0_12 = arith.constant 0 : index
    %c0_13 = arith.constant 0 : index
    %13 = vector.load %arg3[%c1_11, %c0_12, %c0_13] : memref<5x1x128xf32, #tpu.memory_space<vmem>>, vector<1x1x128xf32>
    %14 = vector.shape_cast %13 : vector<1x1x128xf32> to vector<1x128xf32>
    %15 = vector.broadcast %14 : vector<1x128xf32> to vector<16x128xf32>
    %16 = arith.addf %12, %15 : vector<16x128xf32>
    %cst_14 = arith.constant 0.000000e+00 : f32
    %17 = vector.broadcast %cst_14 : f32 to vector<16x128xf32>
    %18 = arith.maximumf %16, %17 : vector<16x128xf32>
    %c2 = arith.constant 2 : index
    %c0_15 = arith.constant 0 : index
    %c0_16 = arith.constant 0 : index
    %19 = vector.load %arg2[%c2, %c0_15, %c0_16] : memref<5x128x128xf32, #tpu.memory_space<vmem>>, vector<1x128x128xf32>
    %20 = vector.shape_cast %19 : vector<1x128x128xf32> to vector<128x128xf32>
    %cst_17 = arith.constant dense<0.000000e+00> : vector<16x128xf32>
    %21 = tpu.matmul %18, %20, %cst_17 {dimension_numbers = #tpu.dot_dimension_numbers<[1], [0], [0], [1], [0, 0, 1, 1], [], []>} : vector<16x128xf32>, vector<128x128xf32>, vector<16x128xf32> -> vector<16x128xf32>
    %c2_18 = arith.constant 2 : index
    %c0_19 = arith.constant 0 : index
    %c0_20 = arith.constant 0 : index
    %22 = vector.load %arg3[%c2_18, %c0_19, %c0_20] : memref<5x1x128xf32, #tpu.memory_space<vmem>>, vector<1x1x128xf32>
    %23 = vector.shape_cast %22 : vector<1x1x128xf32> to vector<1x128xf32>
    %24 = vector.broadcast %23 : vector<1x128xf32> to vector<16x128xf32>
    %25 = arith.addf %21, %24 : vector<16x128xf32>
    %cst_21 = arith.constant 0.000000e+00 : f32
    %26 = vector.broadcast %cst_21 : f32 to vector<16x128xf32>
    %27 = arith.maximumf %25, %26 : vector<16x128xf32>
    %c3 = arith.constant 3 : index
    %c0_22 = arith.constant 0 : index
    %c0_23 = arith.constant 0 : index
    %28 = vector.load %arg2[%c3, %c0_22, %c0_23] : memref<5x128x128xf32, #tpu.memory_space<vmem>>, vector<1x128x128xf32>
    %29 = vector.shape_cast %28 : vector<1x128x128xf32> to vector<128x128xf32>
    %cst_24 = arith.constant dense<0.000000e+00> : vector<16x128xf32>
    %30 = tpu.matmul %27, %29, %cst_24 {dimension_numbers = #tpu.dot_dimension_numbers<[1], [0], [0], [1], [0, 0, 1, 1], [], []>} : vector<16x128xf32>, vector<128x128xf32>, vector<16x128xf32> -> vector<16x128xf32>
    %c3_25 = arith.constant 3 : index
    %c0_26 = arith.constant 0 : index
    %c0_27 = arith.constant 0 : index
    %31 = vector.load %arg3[%c3_25, %c0_26, %c0_27] : memref<5x1x128xf32, #tpu.memory_space<vmem>>, vector<1x1x128xf32>
    %32 = vector.shape_cast %31 : vector<1x1x128xf32> to vector<1x128xf32>
    %33 = vector.broadcast %32 : vector<1x128xf32> to vector<16x128xf32>
    %34 = arith.addf %30, %33 : vector<16x128xf32>
    %cst_28 = arith.constant 0.000000e+00 : f32
    %35 = vector.broadcast %cst_28 : f32 to vector<16x128xf32>
    %36 = arith.maximumf %34, %35 : vector<16x128xf32>
    %c4 = arith.constant 4 : index
    %c0_29 = arith.constant 0 : index
    %c0_30 = arith.constant 0 : index
    %37 = vector.load %arg2[%c4, %c0_29, %c0_30] : memref<5x128x128xf32, #tpu.memory_space<vmem>>, vector<1x128x128xf32>
    %38 = vector.shape_cast %37 : vector<1x128x128xf32> to vector<128x128xf32>
    %cst_31 = arith.constant dense<0.000000e+00> : vector<16x128xf32>
    %39 = tpu.matmul %36, %38, %cst_31 {dimension_numbers = #tpu.dot_dimension_numbers<[1], [0], [0], [1], [0, 0, 1, 1], [], []>} : vector<16x128xf32>, vector<128x128xf32>, vector<16x128xf32> -> vector<16x128xf32>
    %c4_32 = arith.constant 4 : index
    %c0_33 = arith.constant 0 : index
    %c0_34 = arith.constant 0 : index
    %40 = vector.load %arg3[%c4_32, %c0_33, %c0_34] : memref<5x1x128xf32, #tpu.memory_space<vmem>>, vector<1x1x128xf32>
    %41 = vector.shape_cast %40 : vector<1x1x128xf32> to vector<1x128xf32>
    %42 = vector.broadcast %41 : vector<1x128xf32> to vector<16x128xf32>
    %43 = arith.addf %39, %42 : vector<16x128xf32>
    %c0_35 = arith.constant 0 : index
    %c0_36 = arith.constant 0 : index
    %44 = vector.load %arg4[%c0_35, %c0_36] : memref<16x128xf32, #tpu.memory_space<vmem>>, vector<16x128xf32>
    tpu.vector_store %arg4[%c0_35, %c0_36], %43 {strides = array<i32>} : memref<16x128xf32, #tpu.memory_space<vmem>>, vector<16x128xf32>,
    return
  }
  func.func @transform_0(%arg0: i32) -> (i32, i32) {
    %c0_i32 = arith.constant 0 : i32
    %c0_i32_0 = arith.constant 0 : i32
    return %arg0, %c0_i32 : i32, i32
  }
  func.func @transform_1(%arg0: i32) -> (i32, i32, i32) {
    %c0_i32 = arith.constant 0 : i32
    %c0_i32_0 = arith.constant 0 : i32
    %c0_i32_1 = arith.constant 0 : i32
    %c0_i32_2 = arith.constant 0 : i32
    return %c0_i32, %c0_i32_0, %c0_i32_1 : i32, i32, i32
  }
  func.func @transform_2(%arg0: i32) -> (i32, i32, i32) {
    %c0_i32 = arith.constant 0 : i32
    %c0_i32_0 = arith.constant 0 : i32
    %c0_i32_1 = arith.constant 0 : i32
    %c0_i32_2 = arith.constant 0 : i32
    return %c0_i32, %c0_i32_0, %c0_i32_1 : i32, i32, i32
  }
  func.func @transform_3(%arg0: i32) -> (i32, i32) {
    %c0_i32 = arith.constant 0 : i32
    %c0_i32_0 = arith.constant 0 : i32
    return %arg0, %c0_i32 : i32, i32
  }
}

</mosaic_0001>

<bundles_post_ra>
// kernel: tpu_custom_call.1
= control target key start
LH: loop header
LB: loop body
LE: loop exit
PB: predicated region body
PF: predicated region fallthrough
CT: control target
= control target key end

     0   :  { %8 = vsyncpa [#allocation3], 0  ;;  %s1167_s0 = inlined_call_operand.hbm [shape: f32[16,128], index: 0, kind: input, shape index: {}]   ;;  %s1168_s1 = inlined_call_operand.hbm [shape: f32[5,128,128], index: 1, kind: input, shape index: {}]   ;;  %s1169_s2 = inlined_call_operand.vmem [shape: f32[5,1,128], index: 2, kind: input, shape index: {}]   ;;  %s1170_s3 = inlined_call_operand.hbm [shape: f32[16,128], index: 3, kind: output, shape index: {}]  }
   0x1   :  { %9 = vsyncpa [#allocation6], 0 }
   0x2   :  { %10 = vsyncpa [#allocation4], 0  ;;  %s1082_s12 = smov [#allocation2]   ;;  %s1010_s16 = scalar_lea.hbm %s1167_s0, 256 }
   0x3   :  { %s16_s13 = sshll.u32 %s1082_s12, 4  ;;  %p1011_p0 = scmp.ne.s32.totalorder %s1167_s0, %s1010_s16  ;;  %s17_s13 = int_to_ptr.vmem [resolvable:$true] %s16_s13 }
   0x4   :  { %p1014_p1 = scmp.lt.u32.totalorder %s1010_s16, %s1167_s0 }
   0x6   :  { %p1016_p2 = pnand %p1014_p1, %p1011_p0 }
   0x8   :  { %1019 = shalt.err (!%p1016_p2)
}
   0x9   :  { %s1020_s21 = scalar_lea.vmem %s17_s13, 256  ;;  %p1025_p4 = scmp.lt.s32.totalorder %s17_s13, %s17_s13 }
   0xa   :  { %p1021_p3 = scmp.ne.s32.totalorder %s17_s13, %s1020_s21  ;;  %p1026_p5 = scmp.lt.s32.totalorder %s1020_s21, %s1020_s21 }
   0xc   :  { %p1027_p6 = por %p1026_p5, %p1025_p4 }
   0xe   :  { %p1028_p7 = pnand %p1027_p6, %p1021_p3 }
  0x10   :  { %1031 = shalt.err (!%p1028_p7)
}
  0x11   :  { %s1083_s22 = smov 128   ;;  %s1084_s23 = smov 8  }
  0x12   :  { %22 = dma.hbm_to_vmem [thread:$0]  %s1167_s0, 256, %s17_s13, [#allocation3], %s1083_s22, %s1083_s22, %s1084_s23  }
  0x13   :  { %s1085_s26 = smov [#allocation5]   ;;  %s1032_s30 = scalar_lea.hbm %s1168_s1, 10240 }
  0x14   :  { %s28_s27 = sshll.u32 %s1085_s26, 4  ;;  %p1033_p8 = scmp.ne.s32.totalorder %s1168_s1, %s1032_s30  ;;  %s29_s27 = int_to_ptr.vmem [resolvable:$true] %s28_s27 }
  0x15   :  { %p1036_p9 = scmp.lt.u32.totalorder %s1032_s30, %s1168_s1 }
  0x17   :  { %p1038_p10 = pnand %p1036_p9, %p1033_p8 }
  0x19   :  { %1041 = shalt.err (!%p1038_p10)
}
  0x1a   :  { %s1042_s8 = scalar_lea.vmem %s29_s27, 10240  ;;  %p1047_p12 = scmp.lt.s32.totalorder %s29_s27, %s29_s27 }
  0x1b   :  { %p1043_p11 = scmp.ne.s32.totalorder %s29_s27, %s1042_s8  ;;  %p1048_p13 = scmp.lt.s32.totalorder %s1042_s8, %s1042_s8 }
  0x1d   :  { %p1049_p0 = por %p1048_p13, %p1047_p12 }
  0x1f   :  { %p1050_p1 = pnand %p1049_p0, %p1043_p11 }
  0x21   :  { %1053 = shalt.err (!%p1050_p1)
}
  0x22   :  { %34 = dma.hbm_to_vmem [thread:$0]  %s1168_s1, 10240, %s29_s27, [#allocation6], %s1083_s22, %s1083_s22, %s1084_s23  }
  0x23   :  { %1076 = dma.done.wait [#allocation3], 256  }
  0x24   :  { %1077 = vsyncadd [#allocation3], 4294967040 }
  0x25   :  { %1078 = dma.done.wait [#allocation6], 10240  }
  0x26   :  { %1079 = vsyncadd [#allocation6], 4294957056  ;;  %v45_v0 = vld [vmem:[#allocation5] sm:$0xff]  ;;  %v46_v1 = vld [vmem:[#allocation5 + $0x8] sm:$0xff]  ;;  %s1086_s19 = smov [#allocation7]  }
  0x27   :  { %v47_v2 = vld [vmem:[#allocation5 + $0x10] sm:$0xff]  ;;  %v845_v3 = vpack.c.bf16 %v46_v1, %v45_v0  ;;  %v48_v4 = vld [vmem:[#allocation5 + $0x18] sm:$0xff]  ;;  %v49_v6 = vld [vmem:[#allocation5 + $0x20] sm:$0xff]  ;;  %s558_s20 = sshll.u32 %s1086_s19, 4  ;;  %s559_s20 = int_to_ptr.vmem [resolvable:$true] %s558_s20 }
  0x28   :  { %v849_v5 = vpack.c.bf16 %v48_v4, %v47_v2  ;;  %v50_v7 = vld [vmem:[#allocation5 + $0x28] sm:$0xff]  ;;  %v51_v9 = vld [vmem:[#allocation5 + $0x30] sm:$0xff]  ;;  %v52_v10 = vld [vmem:[#allocation5 + $0x38] sm:$0xff]  ;;  %s1054_s21 = scalar_lea.vmem %s559_s20, 256  ;;  %p1059_p3 = scmp.lt.s32.totalorder %s559_s20, %s559_s20 }
  0x29   :  { %846 = vmatprep.subr.bf16.mxu0 %v845_v3  ;;  %v853_v8 = vpack.c.bf16 %v50_v7, %v49_v6  ;;  %v43_v11 = vld [vmem:[#allocation2] sm:$0xff]  ;;  %v146_v12 = vld [vmem:[#allocation5 + $0x80] sm:$0xff]  ;;  %v147_v13 = vld [vmem:[#allocation5 + $0x88] sm:$0xff]  ;;  %v857_v20 = vpack.c.bf16 %v52_v10, %v51_v9  ;;  %p1055_p2 = scmp.ne.s32.totalorder %s559_s20, %s1054_s21  ;;  %p1060_p4 = scmp.lt.s32.totalorder %s1054_s21, %s1054_s21 }
  0x2a   :  { %848 = vmatpush3.bf16.msra.mxu0 %v845_v3  ;;  %702 = vmatprep.mubr.f32.mxu0 %v43_v11  ;;  %v148_v14 = vld [vmem:[#allocation5 + $0x90] sm:$0xff]  ;;  %v877_v15 = vpack.c.bf16 %v147_v13, %v146_v12  ;;  %v149_v16 = vld [vmem:[#allocation5 + $0x98] sm:$0xff]  ;;  %v150_v18 = vld [vmem:[#allocation5 + $0xa0] sm:$0xff] }
  0x2b   :  { %850 = vmatprep.subr.bf16.mxu0 %v849_v5  ;;  %v881_v17 = vpack.c.bf16 %v149_v16, %v148_v14  ;;  %v151_v19 = vld [vmem:[#allocation5 + $0xa8] sm:$0xff]  ;;  %v53_v21 = vld [vmem:[#allocation5 + $0x40] sm:$0xff]  ;;  %v152_v24 = vld [vmem:[#allocation5 + $0xb0] sm:$0xff]  ;;  %p1061_p5 = por %p1060_p4, %p1059_p3 }
  0x2c   :  { %878 = vmatprep.subr.bf16.mxu1 %v877_v15  ;;  %v54_v22 = vld [vmem:[#allocation5 + $0x48] sm:$0xff]  ;;  %v885_v23 = vpack.c.bf16 %v151_v19, %v150_v18  ;;  %v153_v25 = vld [vmem:[#allocation5 + $0xb8] sm:$0xff]  ;;  %v55_v27 = vld [vmem:[#allocation5 + $0x50] sm:$0xff] }
  0x2d   :  { %880 = vmatpush3.bf16.msra.mxu1 %v877_v15  ;;  %v861_v26 = vpack.c.bf16 %v54_v22, %v53_v21  ;;  %v56_v28 = vld [vmem:[#allocation5 + $0x58] sm:$0xff]  ;;  %v889_v29 = vpack.c.bf16 %v153_v25, %v152_v24  ;;  %v154_v30 = vld [vmem:[#allocation5 + $0xc0] sm:$0xff]  ;;  %v155_v31 = vld [vmem:[#allocation5 + $0xc8] sm:$0xff]  ;;  %p1062_p6 = pnand %p1061_p5, %p1055_p2 }
  0x2e   :  { %852 = vmatpush3.bf16.msra.mxu0 %v849_v5  ;;  %882 = vmatprep.subr.bf16.mxu1 %v881_v17  ;;  %v865_v32 = vpack.c.bf16 %v56_v28, %v55_v27  ;;  %v57_v33 = vld [vmem:[#allocation5 + $0x60] sm:$0xff]  ;;  %v58_v34 = vld [vmem:[#allocation5 + $0x68] sm:$0xff]  ;;  %v893_v35 = vpack.c.bf16 %v155_v31, %v154_v30  ;;  %v156_v36 = vld [vmem:[#allocation5 + $0xd0] sm:$0xff] }
  0x2f   :  { %854 = vmatprep.subr.bf16.mxu0 %v853_v8  ;;  %v157_v37 = vld [vmem:[#allocation5 + $0xd8] sm:$0xff]  ;;  %v869_v38 = vpack.c.bf16 %v58_v34, %v57_v33  ;;  %v59_v39 = vld [vmem:[#allocation5 + $0x70] sm:$0xff]  ;;  %v158_v42 = vld [vmem:[#allocation5 + $0xe0] sm:$0xff] }
  0x30   :  { %v60_v40 = vld [vmem:[#allocation5 + $0x78] sm:$0xff]  ;;  %v897_v41 = vpack.c.bf16 %v157_v37, %v156_v36  ;;  %v159_v43 = vld [vmem:[#allocation5 + $0xe8] sm:$0xff]  ;;  %v160_v47 = vld [vmem:[#allocation5 + $0xf0] sm:$0xff] }
  0x31   :  { %884 = vmatpush3.bf16.msra.mxu1 %v881_v17  ;;  %v873_v44 = vpack.c.bf16 %v60_v40, %v59_v39  ;;  %v901_v45 = vpack.c.bf16 %v159_v43, %v158_v42  ;;  %v44_v46 = vld [vmem:[#allocation2 + $0x8] sm:$0xff]  ;;  %v248_v50 = vld [vmem:[#allocation5 + $0x100] sm:$0xff]  ;;  %v249_v51 = vld [vmem:[#allocation5 + $0x108] sm:$0xff] }
  0x32   :  { %856 = vmatpush3.bf16.msra.mxu0 %v853_v8  ;;  %886 = vmatprep.subr.bf16.mxu1 %v885_v23  ;;  %v161_v48 = vld [vmem:[#allocation5 + $0xf8] sm:$0xff]  ;;  %v250_v52 = vld [vmem:[#allocation5 + $0x110] sm:$0xff]  ;;  %v909_v53 = vpack.c.bf16 %v249_v51, %v248_v50  ;;  %v252_v56 = vld [vmem:[#allocation5 + $0x120] sm:$0xff] }
  0x33   :  { %858 = vmatprep.subr.bf16.mxu0 %v857_v20  ;;  %v905_v49 = vpack.c.bf16 %v161_v48, %v160_v47  ;;  %v251_v54 = vld [vmem:[#allocation5 + $0x118] sm:$0xff]  ;;  %v253_v57 = vld [vmem:[#allocation5 + $0x128] sm:$0xff]  ;;  %v254_v59 = vld [vmem:[#allocation5 + $0x130] sm:$0xff] }
  0x34   :  { %v913_v55 = vpack.c.bf16 %v251_v54, %v250_v52  ;;  %v917_v58 = vpack.c.bf16 %v253_v57, %v252_v56  ;;  %v255_v60 = vld [vmem:[#allocation5 + $0x138] sm:$0xff]  ;;  %v256_v62 = vld [vmem:[#allocation5 + $0x140] sm:$0xff]  ;;  %v257_v63 = vld [vmem:[#allocation5 + $0x148] sm:$0xff] }
  0x35   :  { %888 = vmatpush3.bf16.msra.mxu1 %v885_v23  ;;  %v921_v61 = vpack.c.bf16 %v255_v60, %v254_v59  ;;  %v925_v0 = vpack.c.bf16 %v257_v63, %v256_v62  ;;  %v258_v1 = vld [vmem:[#allocation5 + $0x150] sm:$0xff]  ;;  %v259_v2 = vld [vmem:[#allocation5 + $0x158] sm:$0xff]  ;;  %v260_v4 = vld [vmem:[#allocation5 + $0x160] sm:$0xff] }
  0x36   :  { %860 = vmatpush3.bf16.msra.mxu0 %v857_v20  ;;  %890 = vmatprep.subr.bf16.mxu1 %v889_v29  ;;  %v929_v3 = vpack.c.bf16 %v259_v2, %v258_v1  ;;  %v261_v5 = vld [vmem:[#allocation5 + $0x168] sm:$0xff]  ;;  %v571_v7 = vld [vmem:[%s1169_s2] ss:$0 sm:$0xff]  ;;  %v263_v15 = vld [vmem:[#allocation5 + $0x178] sm:$0xff] }
  0x37   :  { %862 = vmatprep.subr.bf16.mxu0 %v861_v26  ;;  %v933_v6 = vpack.c.bf16 %v261_v5, %v260_v4  ;;  %v262_v14 = vld [vmem:[#allocation5 + $0x170] sm:$0xff]  ;;  %v350_v17 = vld [vmem:[#allocation5 + $0x180] sm:$0xff]  ;;  %v351_v18 = vld [vmem:[#allocation5 + $0x188] sm:$0xff] }
  0x38   :  { %v937_v16 = vpack.c.bf16 %v263_v15, %v262_v14  ;;  %v352_v19 = vld [vmem:[#allocation5 + $0x190] sm:$0xff]  ;;  %v941_v20 = vpack.c.bf16 %v351_v18, %v350_v17  ;;  %v353_v21 = vld [vmem:[#allocation5 + $0x198] sm:$0xff]  ;;  %v354_v23 = vld [vmem:[#allocation5 + $0x1a0] sm:$0xff] }
  0x39   :  { %892 = vmatpush3.bf16.msra.mxu1 %v889_v29  ;;  %v945_v22 = vpack.c.bf16 %v353_v21, %v352_v19  ;;  %v355_v24 = vld [vmem:[#allocation5 + $0x1a8] sm:$0xff]  ;;  %v357_v27 = vld [vmem:[#allocation5 + $0x1b8] sm:$0xff]  ;;  %v358_v29 = vld [vmem:[#allocation5 + $0x1c0] sm:$0xff] }
  0x3a   :  { %864 = vmatpush3.bf16.msra.mxu0 %v861_v26  ;;  %894 = vmatprep.subr.bf16.mxu1 %v893_v35  ;;  %v949_v25 = vpack.c.bf16 %v355_v24, %v354_v23  ;;  %v356_v26 = vld [vmem:[#allocation5 + $0x1b0] sm:$0xff]  ;;  %v359_v30 = vld [vmem:[#allocation5 + $0x1c8] sm:$0xff]  ;;  %v361_v33 = vld [vmem:[#allocation5 + $0x1d8] sm:$0xff] }
  0x3b   :  { %866 = vmatprep.subr.bf16.mxu0 %v865_v32  ;;  %v953_v28 = vpack.c.bf16 %v357_v27, %v356_v26  ;;  %v957_v31 = vpack.c.bf16 %v359_v30, %v358_v29  ;;  %v363_v36 = vld [vmem:[#allocation5 + $0x1e8] sm:$0xff]  ;;  %v452_v48 = vld [vmem:[#allocation5 + $0x200] sm:$0xff]  ;;  %v454_v50 = vld [vmem:[#allocation5 + $0x210] sm:$0xff] }
  0x3c   :  { %v455_v52 = vld [vmem:[#allocation5 + $0x218] sm:$0xff]  ;;  %v456_v54 = vld [vmem:[#allocation5 + $0x220] sm:$0xff]  ;;  %v458_v57 = vld [vmem:[#allocation5 + $0x230] sm:$0xff] }
  0x3d   :  { %896 = vmatpush3.bf16.msra.mxu1 %v893_v35  ;;  %v362_v35 = vld [vmem:[#allocation5 + $0x1e0] sm:$0xff]  ;;  %v462_v63 = vld [vmem:[#allocation5 + $0x250] sm:$0xff] }
  0x3e   :  { %868 = vmatpush3.bf16.msra.mxu0 %v865_v32  ;;  %898 = vmatprep.subr.bf16.mxu1 %v897_v41  ;;  %v360_v32 = vld [vmem:[#allocation5 + $0x1d0] sm:$0xff]  ;;  %v965_v37 = vpack.c.bf16 %v363_v36, %v362_v35  ;;  %v460_v60 = vld [vmem:[#allocation5 + $0x240] sm:$0xff] }
  0x3f   :  { %870 = vmatprep.subr.bf16.mxu0 %v869_v38  ;;  %v961_v34 = vpack.c.bf16 %v361_v33, %v360_v32  ;;  %v464_v2 = vld [vmem:[#allocation5 + $0x260] sm:$0xff]  ;;  %v575_v5 = vld [vmem:[%s1169_s2 + $0x2] ss:$0 sm:$0xff]  ;;  %v577_v15 = vld [vmem:[%s1169_s2 + $0x3] ss:$0 sm:$0xff] }
  0x41   :  { %900 = vmatpush3.bf16.msra.mxu1 %v897_v41 }
  0x42   :  { %872 = vmatpush3.bf16.msra.mxu0 %v869_v38  ;;  %902 = vmatprep.subr.bf16.mxu1 %v901_v45  ;;  %v573_v38 = vld [vmem:[%s1169_s2 + $0x1] ss:$0 sm:$0xff] }
  0x43   :  { %874 = vmatprep.subr.bf16.mxu0 %v873_v44 }
  0x45   :  { %904 = vmatpush3.bf16.msra.mxu1 %v901_v45  ;;  %v364_v45 = vld [vmem:[#allocation5 + $0x1f0] sm:$0xff] }
  0x46   :  { %876 = vmatpush3.bf16.msra.mxu0 %v873_v44  ;;  %906 = vmatprep.subr.bf16.mxu1 %v905_v49 }
  0x47   :  { %910 = vmatprep.subr.bf16.mxu0 %v909_v53 }
  0x49   :  { %703 = vmatmul.mubr.f32.vlgmr.msra.gmra.mrb[0].mxu0 %v44_v46  ;;  %908 = vmatpush3.bf16.msra.mxu1 %v905_v49  ;;  %v365_v46 = vld [vmem:[#allocation5 + $0x1f8] sm:$0xff]  ;;  %v453_v49 = vld [vmem:[#allocation5 + $0x208] sm:$0xff] }
  0x4a   :  { %912 = vmatpush3.bf16.msra.mxu0 %v909_v53  ;;  %942 = vmatprep.subr.bf16.mxu1 %v941_v20  ;;  %v969_v47 = vpack.c.bf16 %v365_v46, %v364_v45  ;;  %v973_v51 = vpack.c.bf16 %v453_v49, %v452_v48  ;;  %v977_v53 = vpack.c.bf16 %v455_v52, %v454_v50 }
  0x4b   :  { %914 = vmatprep.subr.bf16.mxu0 %v913_v55 }
  0x4e   :  { %916 = vmatpush3.bf16.msra.mxu0 %v913_v55  ;;  %v457_v55 = vld [vmem:[#allocation5 + $0x228] sm:$0xff] }
  0x4f   :  { %918 = vmatprep.subr.bf16.mxu0 %v917_v58  ;;  %v981_v56 = vpack.c.bf16 %v457_v55, %v456_v54 }
  0x52   :  { %920 = vmatpush3.bf16.msra.mxu0 %v917_v58  ;;  %v459_v58 = vld [vmem:[#allocation5 + $0x238] sm:$0xff] }
  0x53   :  { %922 = vmatprep.subr.bf16.mxu0 %v921_v61  ;;  %v985_v59 = vpack.c.bf16 %v459_v58, %v458_v57 }
  0x56   :  { %924 = vmatpush3.bf16.msra.mxu0 %v921_v61  ;;  %v461_v61 = vld [vmem:[#allocation5 + $0x248] sm:$0xff] }
  0x57   :  { %926 = vmatprep.subr.bf16.mxu0 %v925_v0  ;;  %v989_v62 = vpack.c.bf16 %v461_v61, %v460_v60 }
  0x5a   :  { %928 = vmatpush3.bf16.msra.mxu0 %v925_v0  ;;  %v463_v0 = vld [vmem:[#allocation5 + $0x258] sm:$0xff] }
  0x5b   :  { %930 = vmatprep.subr.bf16.mxu0 %v929_v3  ;;  %v993_v1 = vpack.c.bf16 %v463_v0, %v462_v63 }
  0x5e   :  { %932 = vmatpush3.bf16.msra.mxu0 %v929_v3  ;;  %v465_v3 = vld [vmem:[#allocation5 + $0x268] sm:$0xff] }
  0x5f   :  { %934 = vmatprep.subr.bf16.mxu0 %v933_v6  ;;  %v997_v4 = vpack.c.bf16 %v465_v3, %v464_v2 }
  0x62   :  { %936 = vmatpush3.bf16.msra.mxu0 %v933_v6 }
  0x63   :  { %938 = vmatprep.subr.bf16.mxu0 %v937_v16 }
  0x66   :  { %940 = vmatpush3.bf16.msra.mxu0 %v937_v16 }
  0x67   :  { %974 = vmatprep.subr.bf16.mxu0 %v973_v51 }
 0x11c   :  { %v704_v8 = vpop.f32.mrb[0].mxu0 }
 0x11d   :  { %v140_v9 = vadd.f32 %v704_v8, %v571_v7  ;;  %v134_v10 = vpop.f32.mrb[1].mxu0 }
 0x11e   :  { %v135_v11 = vadd.f32 %v571_v7, %v134_v10 }
 0x11f   :  { %v144_v13 = vmax.f32 %v140_v9, 0.0 }
 0x120   :  { %v143_v12 = vmax.f32 %v135_v11, 0.0 }
 0x122   :  { %737 = vmatprep.mubr.f32.mxu1 %v143_v12  ;;  %v466_v12 = vld [vmem:[#allocation5 + $0x270] sm:$0xff] }
 0x123   :  { %738 = vmatmul.mubr.f32.vlgmr.msra.gmra.mrb[0].mxu1 %v144_v13  ;;  %v467_v13 = vld [vmem:[#allocation5 + $0x278] sm:$0xff] }
 0x124   :  { %944 = vmatpush3.bf16.msra.mxu1 %v941_v20  ;;  %v1001_v14 = vpack.c.bf16 %v467_v13, %v466_v12 }
 0x125   :  { %946 = vmatprep.subr.bf16.mxu1 %v945_v22 }
 0x128   :  { %948 = vmatpush3.bf16.msra.mxu1 %v945_v22  ;;  %v579_v22 = vld [vmem:[%s1169_s2 + $0x4] ss:$0 sm:$0xff] }
 0x129   :  { %950 = vmatprep.subr.bf16.mxu1 %v949_v25 }
 0x12c   :  { %952 = vmatpush3.bf16.msra.mxu1 %v949_v25 }
 0x12d   :  { %954 = vmatprep.subr.bf16.mxu1 %v953_v28 }
 0x130   :  { %956 = vmatpush3.bf16.msra.mxu1 %v953_v28 }
 0x131   :  { %958 = vmatprep.subr.bf16.mxu1 %v957_v31 }
 0x134   :  { %960 = vmatpush3.bf16.msra.mxu1 %v957_v31 }
 0x135   :  { %962 = vmatprep.subr.bf16.mxu1 %v961_v34 }
 0x138   :  { %964 = vmatpush3.bf16.msra.mxu1 %v961_v34 }
 0x139   :  { %966 = vmatprep.subr.bf16.mxu1 %v965_v37 }
 0x13c   :  { %968 = vmatpush3.bf16.msra.mxu1 %v965_v37 }
 0x13d   :  { %970 = vmatprep.subr.bf16.mxu1 %v969_v47 }
 0x140   :  { %972 = vmatpush3.bf16.msra.mxu1 %v969_v47 }
 0x1f6   :  { %v739_v39 = vpop.f32.mrb[0].mxu1 }
 0x1f7   :  { %v242_v40 = vadd.f32 %v739_v39, %v573_v38  ;;  %v236_v41 = vpop.f32.mrb[1].mxu1 }
 0x1f8   :  { %v237_v42 = vadd.f32 %v573_v38, %v236_v41 }
 0x1f9   :  { %v246_v44 = vmax.f32 %v242_v40, 0.0 }
 0x1fa   :  { %v245_v43 = vmax.f32 %v237_v42, 0.0 }
 0x1fc   :  { %772 = vmatprep.mubr.f32.mxu0 %v245_v43 }
 0x1fd   :  { %773 = vmatmul.mubr.f32.vlgmr.msra.gmra.mrb[2].mxu0 %v246_v44 }
 0x1fe   :  { %976 = vmatpush3.bf16.msra.mxu0 %v973_v51 }
 0x1ff   :  { %978 = vmatprep.subr.bf16.mxu0 %v977_v53 }
 0x202   :  { %980 = vmatpush3.bf16.msra.mxu0 %v977_v53 }
 0x203   :  { %982 = vmatprep.subr.bf16.mxu0 %v981_v56 }
 0x206   :  { %984 = vmatpush3.bf16.msra.mxu0 %v981_v56 }
 0x207   :  { %986 = vmatprep.subr.bf16.mxu0 %v985_v59 }
 0x20a   :  { %988 = vmatpush3.bf16.msra.mxu0 %v985_v59 }
 0x20b   :  { %990 = vmatprep.subr.bf16.mxu0 %v989_v62 }
 0x20e   :  { %992 = vmatpush3.bf16.msra.mxu0 %v989_v62 }
 0x20f   :  { %994 = vmatprep.subr.bf16.mxu0 %v993_v1 }
 0x212   :  { %996 = vmatpush3.bf16.msra.mxu0 %v993_v1 }
 0x213   :  { %998 = vmatprep.subr.bf16.mxu0 %v997_v4 }
 0x216   :  { %1000 = vmatpush3.bf16.msra.mxu0 %v997_v4 }
 0x217   :  { %1002 = vmatprep.subr.bf16.mxu0 %v1001_v14 }
 0x21a   :  { %1004 = vmatpush3.bf16.msra.mxu0 %v1001_v14 }
 0x2d0   :  { %v774_v6 = vpop.f32.mrb[2].mxu0 }
 0x2d1   :  { %v344_v7 = vadd.f32 %v774_v6, %v575_v5  ;;  %v338_v8 = vpop.f32.mrb[3].mxu0 }
 0x2d2   :  { %v339_v9 = vadd.f32 %v575_v5, %v338_v8 }
 0x2d3   :  { %v348_v11 = vmax.f32 %v344_v7, 0.0 }
 0x2d4   :  { %v347_v10 = vmax.f32 %v339_v9, 0.0 }
 0x2d6   :  { %807 = vmatprep.mubr.f32.mxu1 %v347_v10 }
 0x2d7   :  { %808 = vmatmul.mubr.f32.vlgmr.msra.gmra.mrb[2].mxu1 %v348_v11 }
 0x3aa   :  { %v809_v16 = vpop.f32.mrb[2].mxu1 }
 0x3ab   :  { %v446_v17 = vadd.f32 %v809_v16, %v577_v15  ;;  %v440_v18 = vpop.f32.mrb[3].mxu1 }
 0x3ac   :  { %v441_v19 = vadd.f32 %v577_v15, %v440_v18 }
 0x3ad   :  { %v450_v21 = vmax.f32 %v446_v17, 0.0 }
 0x3ae   :  { %v449_v20 = vmax.f32 %v441_v19, 0.0 }
 0x3b0   :  { %842 = vmatprep.mubr.f32.mxu0 %v449_v20 }
 0x3b1   :  { %843 = vmatmul.mubr.f32.vlgmr.msra.gmra.mrb[4].mxu0 %v450_v21 }
 0x484   :  { %v844_v23 = vpop.f32.mrb[4].mxu0 }
 0x485   :  { %v548_v24 = vadd.f32 %v844_v23, %v579_v22  ;;  %v542_v25 = vpop.f32.mrb[5].mxu0 }
 0x486   :  { %v543_v26 = vadd.f32 %v579_v22, %v542_v25 }
 0x487   :  { %552 = vst [vmem:[#allocation7 + $0x8] sm:$0xff] %v548_v24 }
 0x488   :  { %551 = vst [vmem:[#allocation7] sm:$0xff] %v543_v26 }
 0x489   :  { %1065 = shalt.err (!%p1062_p6)
}
 0x48a   :  { %s1066_s2 = scalar_lea.hbm %s1170_s3, 256 }
 0x48b   :  { %p1067_p7 = scmp.ne.s32.totalorder %s1170_s3, %s1066_s2  ;;  %p1070_p8 = scmp.lt.u32.totalorder %s1066_s2, %s1170_s3 }
 0x48d   :  { %p1072_p9 = pnand %p1070_p8, %p1067_p7 }
 0x48f   :  { %1075 = shalt.err (!%p1072_p9)
}
 0x490   :  { %564 = dma.vmem_to_hbm [thread:$0]  %s559_s20, 256, %s1170_s3, [#allocation4], %s1083_s22, %s1083_s22, %s1084_s23  }
 0x491   :  { %1080 = dma.done.wait [#allocation4], 256  }
 0x492   :  { %1081 = vsyncadd [#allocation4], 4294967040 }
 0x493   :  { %568 = vsyncpa [#allocation3], 1 }
 0x494   :  { %569 = vsyncpa [#allocation6], 1 }
 0x495   :  { %570 = vsyncpa [#allocation4], 1 }

</bundles_post_ra>
